<compile_context>
chip_gen: v6e
topology: v6e:2x2x1
jax: 0.10.0
libtpu: 0.0.40
codegen_flags: <defaults>
</compile_context>

<pallas_src>
from functools import partial

import jax
import jax.numpy as jnp
import numpy as np
from jax.experimental import pallas as pl
from jax.experimental.pallas import tpu as pltpu


def _drop_path_kernel(x_ref, s_ref, o_ref):
    # x_ref: (TB, TF) input tile, s_ref: (TB, 1) per-sample scale (f32).
    scale = s_ref[...].astype(x_ref.dtype)          # tiny cast, (TB, 1)
    o_ref[...] = (x_ref[...] * scale).astype(o_ref.dtype)


def _choose_tiles(B, Fp, itemsize, budget=2 * 1024 * 1024):
    """Pick (TB, TF): sublane-aligned batch tile, lane-dense feature tile."""
    TB = 8 if (B % 8 == 0) else B          # TB == B is always a legal block dim
    S = Fp // 128
    t_max = max(1, min(S, budget // max(1, TB * 128 * itemsize)))
    # largest divisor of S not exceeding t_max (t=1 always works)
    t = max(d for d in range(1, t_max + 1) if S % d == 0)
    TF = t * 128
    # Whole feature row fits in one block -> grow the batch tile instead so
    # each grid step still moves ~budget bytes (amortizes per-step overhead).
    if TF == Fp and B % 8 == 0:
        nb = B // 8
        n_max = max(1, min(nb, budget // max(1, 8 * Fp * itemsize)))
        n = max(d for d in range(1, n_max + 1) if nb % d == 0)
        TB = 8 * n
    return TB, TF


def drop_path_pallas(x, drop_prob: float = 0.0, training: bool = False, seed: int = 0):
    """Pallas implementation of timm-style drop_path (stochastic depth)."""
    if drop_prob == 0.0 or not training:
        return x

    keep_prob = 1.0 - float(drop_prob)
    B = int(x.shape[0])
    F = int(np.prod(x.shape[1:])) if x.ndim > 1 else 1

    # Per-sample scale: floor(keep_prob + u) / keep_prob  -> 0 or 1/keep_prob.
    key = jax.random.PRNGKey(seed)
    u = jax.random.uniform(key, (B, 1), dtype=jnp.float32)
    scale = jnp.floor(jnp.float32(keep_prob) + u) * jnp.float32(1.0 / keep_prob)

    # Lane-dense 2-D view of the features.
    x2 = x.reshape(B, F)
    itemsize = jnp.dtype(x.dtype).itemsize
    budget = 2 * 1024 * 1024

    padded = False
    if F % 128 == 0:
        Fp = F
        TB, TF = _choose_tiles(B, Fp, itemsize, budget)
    else:
        TB = 8 if (B % 8 == 0) else B
        if TB * F * itemsize <= budget:
            # Full-extent feature block: legal for any F, no pad/slice passes.
            Fp, TF = F, F
        else:
            Fp = ((F + 127) // 128) * 128
            x2 = jnp.pad(x2, ((0, 0), (0, Fp - F)))
            padded = True
            TB, TF = _choose_tiles(B, Fp, itemsize, budget)

    out = pl.pallas_call(
        _drop_path_kernel,
        out_shape=jax.ShapeDtypeStruct((B, Fp), x.dtype),
        grid=(B // TB, Fp // TF),
        in_specs=[
            pl.BlockSpec((TB, TF), lambda i, j: (i, j)),
            pl.BlockSpec((TB, 1), lambda i, j: (i, 0)),
        ],
        out_specs=pl.BlockSpec((TB, TF), lambda i, j: (i, j)),
        compiler_params=pltpu.CompilerParams(
            dimension_semantics=("parallel", "parallel")
        ),
    )(x2, scale)

    if padded:
        out = out[:, :F]
    return out.reshape(x.shape)


class DropPath:
    """Mirror of the PyTorch DropPath module (forward only)."""

    def __init__(self, drop_prob=None):
        self.drop_prob = drop_prob if drop_prob is not None else 0.0
        self.training = True

    def __call__(self, x, seed: int = 0):
        return drop_path_pallas(x, self.drop_prob, self.training, seed)


if __name__ == "__main__":
    key = jax.random.PRNGKey(0)
    B, C, H, W = 2, 4, 16, 16
    x = jax.random.normal(key, (B, C, H, W), dtype=jnp.float32)

    drop_prob = 0.25
    keep_prob = 1.0 - drop_prob
    seed = 1234

    # Training path.
    module = DropPath(drop_prob=drop_prob)
    module.training = True
    y = jax.block_until_ready(module(x, seed=seed))

    # Exact reference using the same host-side RNG draw.
    u_ref = jax.random.uniform(jax.random.PRNGKey(seed), (B, 1), dtype=jnp.float32)
    scale_ref = np.floor(keep_prob + np.asarray(u_ref)) / keep_prob  # (B, 1)
    expected = np.asarray(x) * scale_ref.reshape(B, 1, 1, 1)
    np.testing.assert_allclose(np.asarray(y), expected, rtol=1e-6, atol=1e-6)

    # Each sample row is either exactly 0 or x / keep_prob.
    y_np = np.asarray(y).reshape(B, -1)
    x_np = np.asarray(x).reshape(B, -1)
    for b in range(B):
        dropped = np.allclose(y_np[b], 0.0)
        kept = np.allclose(y_np[b], x_np[b] / keep_prob, rtol=1e-6, atol=1e-6)
        assert dropped or kept, f"sample {b}: not a valid drop-path output"

    # Ragged-F path (F % 128 != 0) -> full-extent feature block, no padding.
    x_r = jax.random.normal(jax.random.PRNGKey(2), (2, 3, 5, 7), dtype=jnp.float32)
    y_r = jax.block_until_ready(drop_path_pallas(x_r, drop_prob, True, seed=7))
    u_r = jax.random.uniform(jax.random.PRNGKey(7), (2, 1), dtype=jnp.float32)
    s_r = np.floor(keep_prob + np.asarray(u_r)) / keep_prob
    np.testing.assert_allclose(
        np.asarray(y_r), np.asarray(x_r) * s_r.reshape(2, 1, 1, 1), rtol=1e-6, atol=1e-6
    )

    # Eval path (training=False) must be identity.
    module.training = False
    y_eval = jax.block_until_ready(module(x))
    assert np.allclose(np.asarray(y_eval), np.asarray(x))

    print("KERNEL_OK")
</pallas_src>

<mosaic_0001>
module attributes {stable_mosaic.version = 11 : i64} {
  func.func @_drop_path_kernel(%arg0: i32, %arg1: i32, %arg2: memref<2x1024xf32, #tpu.memory_space<vmem>>, %arg3: memref<2x1xf32, #tpu.memory_space<vmem>>, %arg4: memref<2x1024xf32, #tpu.memory_space<vmem>>) attributes {dimension_semantics = [#tpu.dimension_semantics<parallel>, #tpu.dimension_semantics<parallel>], iteration_bounds = array<i64: 1, 1>, scalar_prefetch = 0 : i64, scratch_operands = 0 : i64, tpu.core_type = #tpu.core_type<tc>, window_params = [{transform_indices = @transform_0, window_bounds = array<i64: 2, 1024>}, {transform_indices = @transform_1, window_bounds = array<i64: 2, 1>}, {transform_indices = @transform_2, window_bounds = array<i64: 2, 1024>}]} {
    %c0 = arith.constant 0 : index
    %c0_0 = arith.constant 0 : index
    %0 = vector.load %arg3[%c0, %c0_0] : memref<2x1xf32, #tpu.memory_space<vmem>>, vector<2x1xf32>
    %c0_1 = arith.constant 0 : index
    %c0_2 = arith.constant 0 : index
    %1 = vector.load %arg2[%c0_1, %c0_2] : memref<2x1024xf32, #tpu.memory_space<vmem>>, vector<2x1024xf32>
    %2 = vector.broadcast %0 : vector<2x1xf32> to vector<2x1024xf32>
    %3 = arith.mulf %1, %2 : vector<2x1024xf32>
    %c0_3 = arith.constant 0 : index
    %c0_4 = arith.constant 0 : index
    %4 = vector.load %arg4[%c0_3, %c0_4] : memref<2x1024xf32, #tpu.memory_space<vmem>>, vector<2x1024xf32>
    tpu.vector_store %arg4[%c0_3, %c0_4], %3 {strides = array<i32>} : memref<2x1024xf32, #tpu.memory_space<vmem>>, vector<2x1024xf32>,
    return
  }
  func.func @transform_0(%arg0: i32, %arg1: i32) -> (i32, i32) {
    %c0_i32 = arith.constant 0 : i32
    return %arg0, %arg1 : i32, i32
  }
  func.func @transform_1(%arg0: i32, %arg1: i32) -> (i32, i32) {
    %c0_i32 = arith.constant 0 : i32
    %c0_i32_0 = arith.constant 0 : i32
    return %arg0, %c0_i32 : i32, i32
  }
  func.func @transform_2(%arg0: i32, %arg1: i32) -> (i32, i32) {
    %c0_i32 = arith.constant 0 : i32
    return %arg0, %arg1 : i32, i32
  }
}

</mosaic_0001>

<bundles_post_ra>
// kernel: tpu_custom_call.1
= control target key start
LH: loop header
LB: loop body
LE: loop exit
PB: predicated region body
PF: predicated region fallthrough
CT: control target
= control target key end

     0   :  { %7 = vsyncpa [#allocation3], 0  ;;  %s135_s0 = inlined_call_operand.hbm [shape: f32[2,1024], index: 0, kind: input, shape index: {}]   ;;  %s136_s1 = inlined_call_operand.vmem [shape: f32[2,1], index: 1, kind: input, shape index: {}]   ;;  %s137_s2 = inlined_call_operand.hbm [shape: f32[2,1024], index: 2, kind: output, shape index: {}]  }
   0x1   :  { %8 = vsyncpa [#allocation4], 0  ;;  %s107_s9 = smov [#allocation2]  }
   0x2   :  { %s15_s10 = sshll.u32 %s107_s9, 4  ;;  %s16_s10 = int_to_ptr.vmem [resolvable:$true] %s15_s10 }
   0x3   :  { %s71_s11 = scalar_lea.vmem %s16_s10, 256  ;;  %p76_p1 = scmp.lt.s32.totalorder %s16_s10, %s16_s10 }
   0x4   :  { %p72_p0 = scmp.ne.s32.totalorder %s16_s10, %s71_s11  ;;  %p77_p2 = scmp.lt.s32.totalorder %s71_s11, %s71_s11 }
   0x6   :  { %p78_p3 = por %p77_p2, %p76_p1 }
   0x8   :  { %p79_p4 = pnand %p78_p3, %p72_p0 }
   0xa   :  { %82 = shalt.err (!%p79_p4)
}
   0xb   :  { %18 = dma.hbm_to_vmem [thread:$0]  %s135_s0, 256, %s16_s10, [#allocation3]  }
   0xc   :  { %103 = dma.done.wait [#allocation3], 256  }
   0xd   :  { %104 = vsyncadd [#allocation3], 4294967040  ;;  %v108_v0 = vmov 0   ;;  %v24_v1 = vld [vmem:[%s136_s1] sm:$0x3]  ;;  %v34_v4 = vlaneseq  ;;  %v26_v9 = vld [vmem:[#allocation2 + $0x8] sm:$0xff] }
   0xe   :  { %62 = vset.pattern.permute.xlu0 %v108_v0  ;;  %v109_v2 = vmov 269488144   ;;  %v25_v8 = vld [vmem:[#allocation2] sm:$0xff]  ;;  %s110_s16 = smov [#allocation5]  }
   0xf   :  { %29 = vperm.xlu0 %62, %v24_v1   ;;  %v32_v3 = vunpack.c.l.s4 %v109_v2  ;;  %v35_v6 = vshrl.u32 %v34_v4, 7  ;;  %s49_s0 = sshll.u32 %s110_s16, 4  ;;  %s50_s0 = int_to_ptr.vmem [resolvable:$true] %s49_s0 }
  0x10   :  { %s83_s17 = scalar_lea.vmem %s50_s0, 256  ;;  %p88_p6 = scmp.lt.s32.totalorder %s50_s0, %s50_s0 }
  0x11   :  { %v33_v5 = vunpack.c.0.s8 %v32_v3  ;;  %p84_p5 = scmp.ne.s32.totalorder %s50_s0, %s83_s17  ;;  %p89_p7 = scmp.lt.s32.totalorder %s83_s17, %s83_s17 }
  0x13   :  { %v36_v7 = vsub.s32 %v33_v5, %v35_v6  ;;  %p90_p8 = por %p89_p7, %p88_p6 }
  0x15   :  { %p91_p9 = pnand %p90_p8, %p84_p5 }
  0x8a   :  { %v30_v10 = vpop.permute.xlu0 %29 }
  0x8b   :  { %v37_v11 = vrot.slane %v30_v10, %v36_v7 }
  0x8d   :  { %v39_v12 = vmul.f32 %v37_v11, %v25_v8  ;;  %v40_v13 = vmul.f32 %v37_v11, %v26_v9 }
  0x8f   :  { %41 = vst [vmem:[#allocation5] sm:$0xff] %v39_v12  ;;  %42 = vst [vmem:[#allocation5 + $0x8] sm:$0xff] %v40_v13 }
  0x90   :  { %94 = shalt.err (!%p91_p9)
}
  0x91   :  { %52 = dma.vmem_to_hbm [thread:$0]  %s50_s0, 256, %s137_s2, [#allocation4]  }
  0x92   :  { %105 = dma.done.wait [#allocation4], 256  }
  0x93   :  { %106 = vsyncadd [#allocation4], 4294967040 }
  0x94   :  { %56 = vsyncpa [#allocation3], 1 }
  0x95   :  { %57 = vsyncpa [#allocation4], 1 }

</bundles_post_ra>
